<compile_context>
chip_gen: v5e
topology: v5e:2x2
jax: 0.10.0
libtpu: 0.0.40
codegen_flags: <defaults>
</compile_context>

<pallas_src>
import functools

import jax
import jax.numpy as jnp
from jax.experimental import pallas as pl
from jax.experimental.pallas import tpu as pltpu


# ----------------------------------------------------------------------------
# Fused kernel: conv3x3 + LeakyReLU + conv3x3 + LeakyReLU + conv1x1 residual.
# Activations stay in lane-dense (rows, W*C) layout; each 3x3 conv is
#   out[r] = x[r-1] @ M[0] + x[r] @ M[1] + x[r+1] @ M[2] + bias
# where M[dy] are precomputed row-band matrices (W-direction shift + zero pad
# folded in) and the +/-1 row shifts are done with a roll + boundary mask.
# ----------------------------------------------------------------------------
def conv_block_kernel(x_ref, m1_ref, b1_ref, m2s_ref, b2_ref, r_ref, br_ref,
                      o_ref, *, slope, img_h):
    x = x_ref[...].astype(jnp.float32)            # (M, W*Cin), M = rows in tile
    m = x.shape[0]

    # Per-row "height within image" index.  Tiles are image-aligned, so this
    # is valid regardless of how many images a tile holds.
    h_idx = jax.lax.broadcasted_iota(jnp.int32, (m, 1), 0) % img_h
    has_above = h_idx != 0              # row h-1 exists within the same image
    has_below = h_idx != (img_h - 1)    # row h+1 exists within the same image

    def shifted(v):
        # v[r-1] (zeros at image-top rows) and v[r+1] (zeros at image-bottom
        # rows).  The roll is a cheap sublane shuffle; its wrapped rows are
        # killed by the same mask that zeroes interior image boundaries.
        down = jnp.where(has_above, jnp.roll(v, 1, axis=0), 0.0)
        up = jnp.where(has_below, jnp.roll(v, -1, axis=0), 0.0)
        return down, up

    def leaky(v):
        return jnp.where(v > 0, v, slope * v)

    # ---- conv1 (3x3, SAME): three MXU dots, one per H-tap -------------------
    # (W*Cin = 64 lanes here, so a lane-axis tap concat would straddle vreg
    # boundaries; keep the taps as separate dots.)
    xd, xu = shifted(x)
    h1 = (jnp.dot(xd, m1_ref[0], preferred_element_type=jnp.float32)
          + jnp.dot(x, m1_ref[1], preferred_element_type=jnp.float32)
          + jnp.dot(xu, m1_ref[2], preferred_element_type=jnp.float32)
          + b1_ref[...])
    h1 = leaky(h1)

    # ---- conv2 (3x3, SAME): taps fused into a single MXU dot ----------------
    # Each tap is W*Cmid = 128 lanes, so the concat is vreg-aligned and the
    # three taps collapse into one (M, 3*W*Cmid) @ (3*W*Cmid, W*Cout) dot.
    h1d, h1u = shifted(h1)
    h1cat = jnp.concatenate([h1d, h1, h1u], axis=1)
    h2 = jnp.dot(h1cat, m2s_ref[...], preferred_element_type=jnp.float32) + b2_ref[...]
    h2 = leaky(h2)

    # ---- 1x1 residual conv (bypasses the LeakyReLUs) -------------------------
    res = jnp.dot(x, r_ref[...], preferred_element_type=jnp.float32) + br_ref[...]

    o_ref[...] = (h2 + res).astype(o_ref.dtype)


# ----------------------------------------------------------------------------
# Weight preprocessing — run once per weight update, NOT per forward.
# NOTE: the banded weights scale as (W*C)^2; at production UNet widths this
# must be re-tiled (W-tile grid axis with halo columns, or per-tap
# (N*H*W,Cin)@(Cin,Cout) dots) with vmem_limit_bytes / single-buffered weight
# specs to respect the v7x 64 MiB VMEM budget.  Fine at this test size.
# ----------------------------------------------------------------------------
def _conv3x3_row_mats(w_hwio, img_w):
    """(3,3,Cin,Cout) -> (3, W*Cin, W*Cout) row-band mats (W-dir pad folded)."""
    kh, kw, _, _ = w_hwio.shape
    mats = []
    for dy in range(kh):
        acc = 0.0
        for dx in range(kw):
            # S[wi, wo] = 1 iff wi == wo + dx - 1 (out-of-range -> zero pad)
            s = jnp.eye(img_w, img_w, k=1 - dx, dtype=w_hwio.dtype)
            acc = acc + jnp.kron(s, w_hwio[dy, dx])
        mats.append(acc)
    return jnp.stack(mats)


def prepare_conv_block_params(params, img_w):
    w1, b1, w2, b2, wr, br = params
    cmid, cout = w1.shape[-1], w2.shape[-1]
    m1 = _conv3x3_row_mats(w1, img_w)                              # (3, W*Cin,  W*Cmid)
    m2s = _conv3x3_row_mats(w2, img_w).reshape(3 * img_w * cmid, img_w * cout)
    r = jnp.kron(jnp.eye(img_w, dtype=wr.dtype), wr)               # (W*Cin, W*Cout)
    b1r = jnp.tile(b1, img_w)[None, :]                             # (1, W*Cmid)
    b2r = jnp.tile(b2, img_w)[None, :]                             # (1, W*Cout)
    brr = jnp.tile(br, img_w)[None, :]                             # (1, W*Cout)
    return (m1, b1r, m2s, b2r, r, brr)


# ----------------------------------------------------------------------------
# Lane-dense layer API: (B*H, W*Cin) rows in -> (B*H, W*Cout) rows out.
# Chain this directly between UNet blocks to avoid NCHW<->rows transposes.
# ----------------------------------------------------------------------------
def conv_block_apply_rows(prepared, x_rows, *, img_h, negative_slope=0.01,
                          num_row_blocks=1):
    m1, b1r, m2s, b2r, r, brr = prepared
    total_rows, wcin = x_rows.shape
    wcmid = m1.shape[-1]
    wcout = m2s.shape[-1]

    if total_rows % num_row_blocks:
        raise ValueError("num_row_blocks must divide the total number of rows")
    rows_per_block = total_rows // num_row_blocks
    if rows_per_block % img_h:
        raise ValueError("row tiles must be aligned to whole images")

    kern = functools.partial(conv_block_kernel, slope=negative_slope,
                             img_h=img_h)

    # num_row_blocks=1 -> single step, biggest dots, no per-step overhead
    # (best for single-TC v5e/v6e); num_row_blocks=2 engages both v7x cores.
    return pl.pallas_call(
        kern,
        out_shape=jax.ShapeDtypeStruct((total_rows, wcout), x_rows.dtype),
        grid=(num_row_blocks,),
        in_specs=[
            pl.BlockSpec((rows_per_block, wcin), lambda i: (i, 0)),
            pl.BlockSpec((3, wcin, wcmid), lambda i: (0, 0, 0)),
            pl.BlockSpec((1, wcmid), lambda i: (0, 0)),
            pl.BlockSpec((3 * wcmid, wcout), lambda i: (0, 0)),
            pl.BlockSpec((1, wcout), lambda i: (0, 0)),
            pl.BlockSpec((wcin, wcout), lambda i: (0, 0)),
            pl.BlockSpec((1, wcout), lambda i: (0, 0)),
        ],
        out_specs=pl.BlockSpec((rows_per_block, wcout), lambda i: (i, 0)),
        compiler_params=pltpu.CompilerParams(
            dimension_semantics=("parallel",)),
    )(x_rows, m1, b1r, m2s, b2r, r, brr)


# ----------------------------------------------------------------------------
# NCHW boundary wrapper (conversion only at the network boundary).
# ----------------------------------------------------------------------------
def conv_block_forward(prepared, x_nchw, *, negative_slope=0.01, norm=False,
                       num_row_blocks=1):
    b, cin, img_h, img_w = x_nchw.shape
    x_rows = jnp.transpose(x_nchw, (0, 2, 3, 1)).reshape(b * img_h, img_w * cin)
    out_rows = conv_block_apply_rows(prepared, x_rows, img_h=img_h,
                                     negative_slope=negative_slope,
                                     num_row_blocks=num_row_blocks)
    cout = out_rows.shape[-1] // img_w
    out = out_rows.reshape(b, img_h, img_w, cout).transpose(0, 3, 1, 2)
    if norm:
        # TODO(synk): InstanceNorm2d (norm=True) runs in plain JAX here, not
        # inside the Pallas kernel (module default is norm=False).
        mu = out.mean(axis=(2, 3), keepdims=True)
        var = ((out - mu) ** 2).mean(axis=(2, 3), keepdims=True)
        out = (out - mu) * jax.lax.rsqrt(var + 1e-5)
    return out


# ----------------------------------------------------------------------------
# Deterministic parameter init + pure-JAX reference
# ----------------------------------------------------------------------------
def init_params(key, cin, cout):
    ks = jax.random.split(key, 6)

    def conv_w(k, kh, kw, ci, co):
        return (jax.random.normal(k, (kh, kw, ci, co), jnp.float32)
                / jnp.sqrt(kh * kw * ci))

    w1 = conv_w(ks[0], 3, 3, cin, cout)
    b1 = 0.01 * jax.random.normal(ks[1], (cout,), jnp.float32)
    w2 = conv_w(ks[2], 3, 3, cout, cout)
    b2 = 0.01 * jax.random.normal(ks[3], (cout,), jnp.float32)
    wr = jax.random.normal(ks[4], (cin, cout), jnp.float32) / jnp.sqrt(cin)
    br = 0.01 * jax.random.normal(ks[5], (cout,), jnp.float32)
    return (w1, b1, w2, b2, wr, br)


def conv_block_ref(params, x_nchw, negative_slope=0.01, norm=False):
    w1, b1, w2, b2, wr, br = params
    x = jnp.transpose(x_nchw, (0, 2, 3, 1))   # NHWC

    def conv(v, w, b, padding):
        y = jax.lax.conv_general_dilated(
            v, w, window_strides=(1, 1), padding=padding,
            dimension_numbers=("NHWC", "HWIO", "NHWC"))
        return y + b

    def lrelu(v):
        return jnp.where(v > 0, v, negative_slope * v)

    h = lrelu(conv(x, w1, b1, "SAME"))
    h = lrelu(conv(h, w2, b2, "SAME"))
    res = conv(x, wr[None, None], br, "VALID")
    y = h + res
    y = jnp.transpose(y, (0, 3, 1, 2))        # NCHW
    if norm:
        mu = y.mean(axis=(2, 3), keepdims=True)
        var = ((y - mu) ** 2).mean(axis=(2, 3), keepdims=True)
        y = (y - mu) * jax.lax.rsqrt(var + 1e-5)
    return y


if __name__ == "__main__":
    B, Cin, Cout, H, W = 2, 4, 8, 16, 16

    key = jax.random.PRNGKey(0)
    kx, kp = jax.random.split(key)
    x = jax.random.normal(kx, (B, Cin, H, W), jnp.float32)   # NCHW like PyTorch
    params = init_params(kp, Cin, Cout)

    # Weight preprocessing runs once (per weight update), not on every forward.
    prepared = jax.block_until_ready(prepare_conv_block_params(params, W))

    fwd = jax.jit(functools.partial(conv_block_forward, norm=False))
    out = jax.block_until_ready(fwd(prepared, x))

    ref = conv_block_ref(params, x)
    assert out.shape == (B, Cout, H, W)
    err = float(jnp.max(jnp.abs(out - ref)))
    assert jnp.allclose(out, ref, atol=1e-4, rtol=1e-4), err

    print("KERNEL_OK")
</pallas_src>

<mosaic_0001>
module attributes {stable_mosaic.version = 11 : i64} {
  func.func @conv_block_kernel(%arg0: i32, %arg1: memref<32x64xf32, #tpu.memory_space<vmem>>, %arg2: memref<3x64x128xf32, #tpu.memory_space<vmem>>, %arg3: memref<1x128xf32, #tpu.memory_space<vmem>>, %arg4: memref<384x128xf32, #tpu.memory_space<vmem>>, %arg5: memref<1x128xf32, #tpu.memory_space<vmem>>, %arg6: memref<64x128xf32, #tpu.memory_space<vmem>>, %arg7: memref<1x128xf32, #tpu.memory_space<vmem>>, %arg8: memref<32x128xf32, #tpu.memory_space<vmem>>) attributes {dimension_semantics = [#tpu.dimension_semantics<parallel>], iteration_bounds = array<i64: 1>, scalar_prefetch = 0 : i64, scratch_operands = 0 : i64, tpu.core_type = #tpu.core_type<tc>, window_params = [{transform_indices = @transform_0, window_bounds = array<i64: 32, 64>}, {pipeline_mode = #tpu.pipeline_mode<synchronous>, transform_indices = @transform_1, window_bounds = array<i64: 3, 64, 128>}, {pipeline_mode = #tpu.pipeline_mode<synchronous>, transform_indices = @transform_2, window_bounds = array<i64: 1, 128>}, {pipeline_mode = #tpu.pipeline_mode<synchronous>, transform_indices = @transform_3, window_bounds = array<i64: 384, 128>}, {pipeline_mode = #tpu.pipeline_mode<synchronous>, transform_indices = @transform_4, window_bounds = array<i64: 1, 128>}, {pipeline_mode = #tpu.pipeline_mode<synchronous>, transform_indices = @transform_5, window_bounds = array<i64: 64, 128>}, {pipeline_mode = #tpu.pipeline_mode<synchronous>, transform_indices = @transform_6, window_bounds = array<i64: 1, 128>}, {transform_indices = @transform_7, window_bounds = array<i64: 32, 128>}]} {
    %c0 = arith.constant 0 : index
    %c0_0 = arith.constant 0 : index
    %0 = vector.load %arg1[%c0, %c0_0] : memref<32x64xf32, #tpu.memory_space<vmem>>, vector<32x64xf32>
    %1 = tpu.iota {dimensions = array<i32: 0>} : vector<32x1xi32>
    %c16_i32 = arith.constant 16 : i32
    %c0_i32 = arith.constant 0 : i32
    %2 = arith.cmpi eq, %c16_i32, %c0_i32 : i32
    %c1_i32 = arith.constant 1 : i32
    %3 = arith.select %2, %c1_i32, %c16_i32 : i32
    %4 = vector.broadcast %3 : i32 to vector<32x1xi32>
    %5 = arith.remsi %1, %4 : vector<32x1xi32>
    %c0_i32_1 = arith.constant 0 : i32
    %6 = vector.broadcast %c0_i32_1 : i32 to vector<32x1xi32>
    %7 = arith.cmpi ne, %5, %6 : vector<32x1xi32>
    %c0_i32_2 = arith.constant 0 : i32
    %8 = vector.broadcast %c0_i32_2 : i32 to vector<32x1xi32>
    %9 = arith.cmpi slt, %5, %8 : vector<32x1xi32>
    %c0_i32_3 = arith.constant 0 : i32
    %10 = arith.cmpi slt, %3, %c0_i32_3 : i32
    %11 = vector.broadcast %10 : i1 to vector<32x1xi1>
    %12 = vector.broadcast %11 : vector<32x1xi1> to vector<32x1xi1>
    %13 = arith.xori %9, %12 : vector<32x1xi1>
    %14 = arith.andi %13, %7 : vector<32x1xi1>
    %15 = vector.broadcast %3 : i32 to vector<32x1xi32>
    %16 = arith.addi %5, %15 : vector<32x1xi32>
    %17 = arith.select %14, %16, %5 : vector<32x1xi1>, vector<32x1xi32>
    %c0_i32_4 = arith.constant 0 : i32
    %18 = vector.broadcast %c0_i32_4 : i32 to vector<32x1xi32>
    %19 = arith.cmpi ne, %17, %18 : vector<32x1xi32>
    %c15_i32 = arith.constant 15 : i32
    %20 = vector.broadcast %c15_i32 : i32 to vector<32x1xi32>
    %21 = arith.cmpi ne, %17, %20 : vector<32x1xi32>
    %22 = vector.extract_strided_slice %0 {offsets = [31, 0], sizes = [1, 64], strides = [1, 1]} : vector<32x64xf32> to vector<1x64xf32>
    %23 = vector.extract_strided_slice %0 {offsets = [0, 0], sizes = [31, 64], strides = [1, 1]} : vector<32x64xf32> to vector<31x64xf32>
    %24 = tpu.concatenate %22, %23 in 0 : vector<1x64xf32>, vector<31x64xf32> -> vector<32x64xf32>
    %cst = arith.constant 0.000000e+00 : f32
    %25 = vector.shape_cast %19 : vector<32x1xi1> to vector<32x1xi1>
    %26 = vector.broadcast %25 : vector<32x1xi1> to vector<32x64xi1>
    %27 = vector.broadcast %cst : f32 to vector<32x64xf32>
    %28 = arith.select %26, %24, %27 : vector<32x64xi1>, vector<32x64xf32>
    %29 = vector.extract_strided_slice %0 {offsets = [1, 0], sizes = [31, 64], strides = [1, 1]} : vector<32x64xf32> to vector<31x64xf32>
    %30 = vector.extract_strided_slice %0 {offsets = [0, 0], sizes = [1, 64], strides = [1, 1]} : vector<32x64xf32> to vector<1x64xf32>
    %31 = tpu.concatenate %29, %30 in 0 : vector<31x64xf32>, vector<1x64xf32> -> vector<32x64xf32>
    %cst_5 = arith.constant 0.000000e+00 : f32
    %32 = vector.shape_cast %21 : vector<32x1xi1> to vector<32x1xi1>
    %33 = vector.broadcast %32 : vector<32x1xi1> to vector<32x64xi1>
    %34 = vector.broadcast %cst_5 : f32 to vector<32x64xf32>
    %35 = arith.select %33, %31, %34 : vector<32x64xi1>, vector<32x64xf32>
    %c0_6 = arith.constant 0 : index
    %c0_7 = arith.constant 0 : index
    %c0_8 = arith.constant 0 : index
    %36 = vector.load %arg2[%c0_6, %c0_7, %c0_8] : memref<3x64x128xf32, #tpu.memory_space<vmem>>, vector<1x64x128xf32>
    %37 = vector.shape_cast %36 : vector<1x64x128xf32> to vector<64x128xf32>
    %cst_9 = arith.constant dense<0.000000e+00> : vector<32x128xf32>
    %38 = tpu.matmul %28, %37, %cst_9 {dimension_numbers = #tpu.dot_dimension_numbers<[1], [0], [0], [1], [0, 0, 1, 1], [], []>} : vector<32x64xf32>, vector<64x128xf32>, vector<32x128xf32> -> vector<32x128xf32>
    %c1 = arith.constant 1 : index
    %c0_10 = arith.constant 0 : index
    %c0_11 = arith.constant 0 : index
    %39 = vector.load %arg2[%c1, %c0_10, %c0_11] : memref<3x64x128xf32, #tpu.memory_space<vmem>>, vector<1x64x128xf32>
    %40 = vector.shape_cast %39 : vector<1x64x128xf32> to vector<64x128xf32>
    %cst_12 = arith.constant dense<0.000000e+00> : vector<32x128xf32>
    %41 = tpu.matmul %0, %40, %cst_12 {dimension_numbers = #tpu.dot_dimension_numbers<[1], [0], [0], [1], [0, 0, 1, 1], [], []>} : vector<32x64xf32>, vector<64x128xf32>, vector<32x128xf32> -> vector<32x128xf32>
    %42 = arith.addf %38, %41 : vector<32x128xf32>
    %c2 = arith.constant 2 : index
    %c0_13 = arith.constant 0 : index
    %c0_14 = arith.constant 0 : index
    %43 = vector.load %arg2[%c2, %c0_13, %c0_14] : memref<3x64x128xf32, #tpu.memory_space<vmem>>, vector<1x64x128xf32>
    %44 = vector.shape_cast %43 : vector<1x64x128xf32> to vector<64x128xf32>
    %cst_15 = arith.constant dense<0.000000e+00> : vector<32x128xf32>
    %45 = tpu.matmul %35, %44, %cst_15 {dimension_numbers = #tpu.dot_dimension_numbers<[1], [0], [0], [1], [0, 0, 1, 1], [], []>} : vector<32x64xf32>, vector<64x128xf32>, vector<32x128xf32> -> vector<32x128xf32>
    %46 = arith.addf %42, %45 : vector<32x128xf32>
    %c0_16 = arith.constant 0 : index
    %c0_17 = arith.constant 0 : index
    %47 = vector.load %arg3[%c0_16, %c0_17] : memref<1x128xf32, #tpu.memory_space<vmem>>, vector<1x128xf32>
    %48 = vector.broadcast %47 : vector<1x128xf32> to vector<32x128xf32>
    %49 = arith.addf %46, %48 : vector<32x128xf32>
    %cst_18 = arith.constant 0.000000e+00 : f32
    %50 = vector.broadcast %cst_18 : f32 to vector<32x128xf32>
    %51 = arith.cmpf ogt, %49, %50 : vector<32x128xf32>
    %cst_19 = arith.constant 0.00999999977 : f32
    %52 = vector.broadcast %cst_19 : f32 to vector<32x128xf32>
    %53 = arith.mulf %52, %49 : vector<32x128xf32>
    %54 = arith.select %51, %49, %53 : vector<32x128xi1>, vector<32x128xf32>
    %55 = vector.extract_strided_slice %54 {offsets = [31, 0], sizes = [1, 128], strides = [1, 1]} : vector<32x128xf32> to vector<1x128xf32>
    %56 = vector.extract_strided_slice %54 {offsets = [0, 0], sizes = [31, 128], strides = [1, 1]} : vector<32x128xf32> to vector<31x128xf32>
    %57 = tpu.concatenate %55, %56 in 0 : vector<1x128xf32>, vector<31x128xf32> -> vector<32x128xf32>
    %cst_20 = arith.constant 0.000000e+00 : f32
    %58 = vector.shape_cast %19 : vector<32x1xi1> to vector<32x1xi1>
    %59 = vector.broadcast %58 : vector<32x1xi1> to vector<32x128xi1>
    %60 = vector.broadcast %cst_20 : f32 to vector<32x128xf32>
    %61 = arith.select %59, %57, %60 : vector<32x128xi1>, vector<32x128xf32>
    %62 = vector.extract_strided_slice %54 {offsets = [1, 0], sizes = [31, 128], strides = [1, 1]} : vector<32x128xf32> to vector<31x128xf32>
    %63 = vector.extract_strided_slice %54 {offsets = [0, 0], sizes = [1, 128], strides = [1, 1]} : vector<32x128xf32> to vector<1x128xf32>
    %64 = tpu.concatenate %62, %63 in 0 : vector<31x128xf32>, vector<1x128xf32> -> vector<32x128xf32>
    %cst_21 = arith.constant 0.000000e+00 : f32
    %65 = vector.shape_cast %21 : vector<32x1xi1> to vector<32x1xi1>
    %66 = vector.broadcast %65 : vector<32x1xi1> to vector<32x128xi1>
    %67 = vector.broadcast %cst_21 : f32 to vector<32x128xf32>
    %68 = arith.select %66, %64, %67 : vector<32x128xi1>, vector<32x128xf32>
    %69 = tpu.concatenate %61, %54, %68 in 1 : vector<32x128xf32>, vector<32x128xf32>, vector<32x128xf32> -> vector<32x384xf32>
    %c0_22 = arith.constant 0 : index
    %c0_23 = arith.constant 0 : index
    %70 = vector.load %arg4[%c0_22, %c0_23] : memref<384x128xf32, #tpu.memory_space<vmem>>, vector<384x128xf32>
    %cst_24 = arith.constant dense<0.000000e+00> : vector<32x128xf32>
    %71 = tpu.matmul %69, %70, %cst_24 {dimension_numbers = #tpu.dot_dimension_numbers<[1], [0], [0], [1], [0, 0, 1, 1], [], []>} : vector<32x384xf32>, vector<384x128xf32>, vector<32x128xf32> -> vector<32x128xf32>
    %c0_25 = arith.constant 0 : index
    %c0_26 = arith.constant 0 : index
    %72 = vector.load %arg5[%c0_25, %c0_26] : memref<1x128xf32, #tpu.memory_space<vmem>>, vector<1x128xf32>
    %73 = vector.broadcast %72 : vector<1x128xf32> to vector<32x128xf32>
    %74 = arith.addf %71, %73 : vector<32x128xf32>
    %cst_27 = arith.constant 0.000000e+00 : f32
    %75 = vector.broadcast %cst_27 : f32 to vector<32x128xf32>
    %76 = arith.cmpf ogt, %74, %75 : vector<32x128xf32>
    %cst_28 = arith.constant 0.00999999977 : f32
    %77 = vector.broadcast %cst_28 : f32 to vector<32x128xf32>
    %78 = arith.mulf %77, %74 : vector<32x128xf32>
    %79 = arith.select %76, %74, %78 : vector<32x128xi1>, vector<32x128xf32>
    %c0_29 = arith.constant 0 : index
    %c0_30 = arith.constant 0 : index
    %80 = vector.load %arg6[%c0_29, %c0_30] : memref<64x128xf32, #tpu.memory_space<vmem>>, vector<64x128xf32>
    %cst_31 = arith.constant dense<0.000000e+00> : vector<32x128xf32>
    %81 = tpu.matmul %0, %80, %cst_31 {dimension_numbers = #tpu.dot_dimension_numbers<[1], [0], [0], [1], [0, 0, 1, 1], [], []>} : vector<32x64xf32>, vector<64x128xf32>, vector<32x128xf32> -> vector<32x128xf32>
    %c0_32 = arith.constant 0 : index
    %c0_33 = arith.constant 0 : index
    %82 = vector.load %arg7[%c0_32, %c0_33] : memref<1x128xf32, #tpu.memory_space<vmem>>, vector<1x128xf32>
    %83 = vector.broadcast %82 : vector<1x128xf32> to vector<32x128xf32>
    %84 = arith.addf %81, %83 : vector<32x128xf32>
    %85 = arith.addf %79, %84 : vector<32x128xf32>
    %c0_34 = arith.constant 0 : index
    %c0_35 = arith.constant 0 : index
    %86 = vector.load %arg8[%c0_34, %c0_35] : memref<32x128xf32, #tpu.memory_space<vmem>>, vector<32x128xf32>
    tpu.vector_store %arg8[%c0_34, %c0_35], %85 {strides = array<i32>} : memref<32x128xf32, #tpu.memory_space<vmem>>, vector<32x128xf32>,
    return
  }
  func.func @transform_0(%arg0: i32) -> (i32, i32) {
    %c0_i32 = arith.constant 0 : i32
    %c0_i32_0 = arith.constant 0 : i32
    return %arg0, %c0_i32 : i32, i32
  }
  func.func @transform_1(%arg0: i32) -> (i32, i32, i32) {
    %c0_i32 = arith.constant 0 : i32
    %c0_i32_0 = arith.constant 0 : i32
    %c0_i32_1 = arith.constant 0 : i32
    %c0_i32_2 = arith.constant 0 : i32
    return %c0_i32, %c0_i32_0, %c0_i32_1 : i32, i32, i32
  }
  func.func @transform_2(%arg0: i32) -> (i32, i32) {
    %c0_i32 = arith.constant 0 : i32
    %c0_i32_0 = arith.constant 0 : i32
    %c0_i32_1 = arith.constant 0 : i32
    return %c0_i32, %c0_i32_0 : i32, i32
  }
  func.func @transform_3(%arg0: i32) -> (i32, i32) {
    %c0_i32 = arith.constant 0 : i32
    %c0_i32_0 = arith.constant 0 : i32
    %c0_i32_1 = arith.constant 0 : i32
    return %c0_i32, %c0_i32_0 : i32, i32
  }
  func.func @transform_4(%arg0: i32) -> (i32, i32) {
    %c0_i32 = arith.constant 0 : i32
    %c0_i32_0 = arith.constant 0 : i32
    %c0_i32_1 = arith.constant 0 : i32
    return %c0_i32, %c0_i32_0 : i32, i32
  }
  func.func @transform_5(%arg0: i32) -> (i32, i32) {
    %c0_i32 = arith.constant 0 : i32
    %c0_i32_0 = arith.constant 0 : i32
    %c0_i32_1 = arith.constant 0 : i32
    return %c0_i32, %c0_i32_0 : i32, i32
  }
  func.func @transform_6(%arg0: i32) -> (i32, i32) {
    %c0_i32 = arith.constant 0 : i32
    %c0_i32_0 = arith.constant 0 : i32
    %c0_i32_1 = arith.constant 0 : i32
    return %c0_i32, %c0_i32_0 : i32, i32
  }
  func.func @transform_7(%arg0: i32) -> (i32, i32) {
    %c0_i32 = arith.constant 0 : i32
    %c0_i32_0 = arith.constant 0 : i32
    return %arg0, %c0_i32 : i32, i32
  }
}

</mosaic_0001>

<bundles_post_ra>
// kernel: conv_block_forward.1
= control target key start
LH: loop header
LB: loop body
LE: loop exit
PB: predicated region body
PF: predicated region fallthrough
CT: control target
= control target key end

     0   :  { %12 = vsyncpa [#allocation3], 0  ;;  %s628_s27 = smov [#allocation2]   ;;  %s629_s29 = smov 128   ;;  %s977_s0 = inlined_call_operand.vmem [shape: f32[32,64], index: 0, kind: input, shape index: {}]   ;;  %s978_s1 = inlined_call_operand.hbm [shape: f32[3,64,128], index: 1, kind: input, shape index: {}]   ;;  %s979_s2 = inlined_call_operand.vmem [shape: f32[1,128], index: 2, kind: input, shape index: {}]   ;;  %s980_s3 = inlined_call_operand.vmem [shape: f32[384,128], index: 3, kind: input, shape index: {}]   ;;  %s981_s4 = inlined_call_operand.vmem [shape: f32[1,128], index: 4, kind: input, shape index: {}]   ;;  %s982_s5 = inlined_call_operand.vmem [shape: f32[64,128], index: 5, kind: input, shape index: {}]   ;;  %s983_s6 = inlined_call_operand.vmem [shape: f32[1,128], index: 6, kind: input, shape index: {}]   ;;  %s984_s7 = inlined_call_operand.vmem [shape: f32[32,128], index: 7, kind: output, shape index: {}]  }
   0x1   :  { %s19_s26 = sshll.u32 %s978_s1, 4  ;;  %s21_s28 = sshll.u32 %s628_s27, 4  ;;  %s20_s26 = int_to_ptr.hbm [resolvable:$true] %s19_s26  ;;  %s22_s28 = int_to_ptr.vmem [resolvable:$true] %s21_s28 }
   0x2   :  { %s630_s30 = smov 8  }
   0x3   :  { %27 = dma.hbm_to_vmem [thread:$0]  %s20_s26, 3072, %s22_s28, [#allocation3], %s629_s29, %s629_s29, %s630_s30  }
   0x4   :  { %626 = dma.done.wait [#allocation3], 3072  }
   0x5   :  { %627 = vsyncadd [#allocation3], 4294964224  ;;  %v46_v0 = vlaneseq  ;;  %v267_v1 = vld [vmem:[#allocation2 + $0xb8] sm:$0xff]  ;;  %v266_v2 = vld [vmem:[#allocation2 + $0xb0] sm:$0xff]  ;;  %vm113_vm0 = vcmask 1040384   ;;  %vm137_vm1 = vcmask 1046528  }
   0x6   :  { %v179_v3 = vld [vmem:[#allocation2 + $0x78] sm:$0xff]  ;;  %288 = vmatpush.msra.mxu2 %v267_v1  ;;  %v178_v5 = vld [vmem:[#allocation2 + $0x70] sm:$0xff]  ;;  %v265_v6 = vld [vmem:[#allocation2 + $0xa8] sm:$0xff]  ;;  %vm180_vm3 = vcmask 523264  }
   0x7   :  { %197 = vmatpush.msra.mxu0 %v179_v3  ;;  %v170_v4 = vld [vmem:[#allocation2 + $0x38] sm:$0xff]  ;;  %v169_v7 = vld [vmem:[#allocation2 + $0x30] sm:$0xff]  ;;  %v177_v8 = vld [vmem:[#allocation2 + $0x68] sm:$0xff]  ;;  %v674_v10 = vshrl.u32 %v46_v0, 7 }
   0x8   :  { %238 = vmatpush.msra.mxu1 %v170_v4  ;;  %289 = vmatpush.msra.mxu2 %v266_v2  ;;  %v168_v9 = vld [vmem:[#allocation2 + $0x28] sm:$0xff]  ;;  %v264_v11 = vld [vmem:[#allocation2 + $0xa0] sm:$0xff]  ;;  %v263_v14 = vld [vmem:[#allocation2 + $0x98] sm:$0xff] }
   0x9   :  { %198 = vmatpush.msra.mxu0 %v178_v5  ;;  %v176_v12 = vld [vmem:[#allocation2 + $0x60] sm:$0xff]  ;;  %v175_v15 = vld [vmem:[#allocation2 + $0x58] sm:$0xff]  ;;  %v684_v18 = vld [vmem:[%s977_s0 + $0x8] sm:$0xff]  ;;  %v55_v19 = vand.u32 15, %v674_v10  ;;  %v48_v30 = vadd.s32 8, %v674_v10  ;;  %v49_v49 = vadd.s32 16, %v674_v10 }
   0xa   :  { %239 = vmatpush.msra.mxu1 %v169_v7  ;;  %290 = vmatpush.msra.mxu2 %v265_v6  ;;  %v167_v13 = vld [vmem:[#allocation2 + $0x20] sm:$0xff]  ;;  %v166_v17 = vld [vmem:[#allocation2 + $0x18] sm:$0xff]  ;;  %v262_v21 = vld [vmem:[#allocation2 + $0x90] sm:$0xff]  ;;  %v139_v26 = vrot.slane %v684_v18, 1  ;;  %v115_v48 = vrot.slane %v684_v18, 7  ;;  %v50_v62 = vadd.s32 24, %v674_v10 }
   0xb   :  { %199 = vmatpush.msra.mxu0 %v177_v8  ;;  %v679_v16 = vld [vmem:[%s977_s0] sm:$0xff]  ;;  %v174_v22 = vld [vmem:[#allocation2 + $0x50] sm:$0xff]  ;;  %v691_v23 = vld [vmem:[%s977_s0 + $0x18] sm:$0xff]  ;;  %vm697_vm2 = vcmp.ne.s32.totalorder %v55_v19, 0  ;;  %v62_v40 = vand.u32 15, %v48_v30  ;;  %v69_v55 = vand.u32 15, %v49_v49 }
   0xc   :  { %240 = vmatpush.msra.mxu1 %v168_v9  ;;  %291 = vmatpush.msra.mxu2 %v264_v11  ;;  %v114_v20 = vrot.slane %v679_v16, 7  ;;  %v165_v24 = vld [vmem:[#allocation2 + $0x10] sm:$0xff]  ;;  %v138_v25 = vrot.slane %v679_v16, 1  ;;  %v108_v27 = vrot.slane %v691_v23, 7  ;;  %v261_v28 = vld [vmem:[#allocation2 + $0x88] sm:$0xff]  ;;  %v260_v35 = vld [vmem:[#allocation2 + $0x80] sm:$0xff] }
   0xd   :  { %200 = vmatpush.msra.mxu0 %v176_v12  ;;  %v173_v29 = vld [vmem:[#allocation2 + $0x48] sm:$0xff]  ;;  %v707_v34 = vld [vmem:[%s977_s0 + $0x10] sm:$0xff]  ;;  %v172_v36 = vld [vmem:[#allocation2 + $0x40] sm:$0xff]  ;;  %vm731_vm4 = vcmp.ne.s32.totalorder %v62_v40, 15  ;;  %v143_v59 = vrot.slane %v691_v23, 1  ;;  %vm769_vm5 = vcmp.ne.s32.totalorder %v69_v55, 0 }
   0xe   :  { %241 = vmatpush.msra.mxu1 %v167_v13  ;;  %292 = vmatpush.msra.mxu2 %v263_v14  ;;  %v164_v31 = vld [vmem:[#allocation2 + $0x8] sm:$0xff]  ;;  %v124_v33 = vsel %vm113_vm0, %v108_v27, %v114_v20  ;;  %v140_v37 = vsel %vm137_vm1, %v138_v25, %v139_v26  ;;  %v163_v38 = vld [vmem:[#allocation2] sm:$0xff]  ;;  %v141_v41 = vrot.slane %v707_v34, 1  ;;  %v402_v42 = vld [vmem:[%s980_s3 + $0xf8] sm:$0xff]  ;;  %v116_v54 = vsel %vm113_vm0, %v114_v20, %v115_v48 }
   0xf   :  { %201 = vmatpush.msra.mxu0 %v175_v15  ;;  %v133_v39 = vsel %vm697_vm2, %v124_v33, 0.0  ;;  %v418_v43 = vld [vmem:[%s980_s3 + $0x178] sm:$0xff]  ;;  %v401_v44 = vld [vmem:[%s980_s3 + $0xf0] sm:$0xff]  ;;  %v400_v50 = vld [vmem:[%s980_s3 + $0xe8] sm:$0xff]  ;;  %v117_v56 = vrot.slane %v707_v34, 7  ;;  %v76_v5 = vand.u32 15, %v50_v62  ;;  %v150_v9 = vsel %vm137_vm1, %v143_v59, %v138_v25 }
  0x10   :  { %242 = vmatpush.msra.mxu1 %v166_v17  ;;  %293 = vmatpush.msra.mxu2 %v262_v21  ;;  %v417_v45 = vld [vmem:[%s980_s3 + $0x170] sm:$0xff]  ;;  %v142_v47 = vsel %vm137_vm1, %v139_v26, %v141_v41  ;;  %v416_v51 = vld [vmem:[%s980_s3 + $0x168] sm:$0xff]  ;;  %v399_v53 = vld [vmem:[%s980_s3 + $0xe0] sm:$0xff]  ;;  %v144_v2 = vsel %vm137_vm1, %v141_v41, %v143_v59 }
  0x11   :  { %202 = vmatpush.msra.mxu0 %v174_v22  ;;  %v160_v52 = vsel %vm731_vm4, %v142_v47, 0.0  ;;  %v398_v57 = vld [vmem:[%s980_s3 + $0xd8] sm:$0xff]  ;;  %v415_v58 = vld [vmem:[%s980_s3 + $0x160] sm:$0xff]  ;;  %v397_v60 = vld [vmem:[%s980_s3 + $0xd0] sm:$0xff]  ;;  %v118_v0 = vsel %vm113_vm0, %v115_v48, %v117_v56  ;;  %vm793_vm6 = vcmp.ne.s32.totalorder %v76_v5, 15  ;;  %v119_v12 = vsel %vm113_vm0, %v117_v56, %v108_v27 }
  0x12   :  { %243 = vmatpush.msra.mxu1 %v165_v24  ;;  %294 = vmatpush.msra.mxu2 %v261_v28  ;;  %v414_v61 = vld [vmem:[%s980_s3 + $0x158] sm:$0xff]  ;;  %v396_v1 = vld [vmem:[%s980_s3 + $0xc8] sm:$0xff]  ;;  %v395_v3 = vld [vmem:[%s980_s3 + $0xc0] sm:$0xff]  ;;  %v135_v4 = vsel %vm769_vm5, %v118_v0, 0.0  ;;  %v162_v11 = vsel %vm793_vm6, %v150_v9, 0.0 }
  0x13   :  { %203 = vmatpush.msra.mxu0 %v173_v29  ;;  %v394_v6 = vld [vmem:[%s980_s3 + $0xb8] sm:$0xff]  ;;  %v393_v7 = vld [vmem:[%s980_s3 + $0xb0] sm:$0xff]  ;;  %v392_v10 = vld [vmem:[%s980_s3 + $0xa8] sm:$0xff] }
  0x14   :  { %244 = vmatpush.msra.mxu1 %v164_v31  ;;  %295 = vmatpush.msra.mxu2 %v260_v35  ;;  %v413_v13 = vld [vmem:[%s980_s3 + $0x150] sm:$0xff]  ;;  %v391_v14 = vld [vmem:[%s980_s3 + $0xa0] sm:$0xff]  ;;  %v412_v15 = vld [vmem:[%s980_s3 + $0x148] sm:$0xff] }
  0x15   :  { %204 = vmatpush.msra.mxu0 %v172_v36  ;;  %584 = vmatmul.msk.f32.vlgmr.msra.gmra.mxu2 %vm180_vm3, %v140_v37  ;;  %v390_v17 = vld [vmem:[%s980_s3 + $0x98] sm:$0xff]  ;;  %v411_v19 = vld [vmem:[%s980_s3 + $0x140] sm:$0xff]  ;;  %v389_v20 = vld [vmem:[%s980_s3 + $0x90] sm:$0xff] }
  0x16   :  { %245 = vmatpush.msra.mxu1 %v163_v38  ;;  %576 = vmatmul.msk.f32.vlgmr.msra.gmra.mxu0 %vm180_vm3, %v679_v16  ;;  %v386_v21 = vld [vmem:[%s980_s3 + $0x78] sm:$0xff]  ;;  %v388_v24 = vld [vmem:[%s980_s3 + $0x88] sm:$0xff]  ;;  %v385_v25 = vld [vmem:[%s980_s3 + $0x70] sm:$0xff] }
  0x17   :  { %580 = vmatmul.msk.f32.vlgmr.msra.gmra.mxu1 %vm180_vm3, %v133_v39  ;;  %452 = vmatpush.msrb.mxu0 %v402_v42  ;;  %v410_v22 = vld [vmem:[%s980_s3 + $0x138] sm:$0xff]  ;;  %v409_v26 = vld [vmem:[%s980_s3 + $0x130] sm:$0xff]  ;;  %v387_v27 = vld [vmem:[%s980_s3 + $0x80] sm:$0xff] }
  0x18   :  { %481 = vmatpush.msrb.mxu1 %v418_v43  ;;  %423 = vmatpush.msra.mxu3 %v386_v21  ;;  %v384_v28 = vld [vmem:[%s980_s3 + $0x68] sm:$0xff]  ;;  %v383_v30 = vld [vmem:[%s980_s3 + $0x60] sm:$0xff]  ;;  %v529_v33 = vld [vmem:[%s982_s5 + $0x38] sm:$0xff] }
  0x19   :  { %453 = vmatpush.msrb.mxu0 %v401_v44  ;;  %v408_v29 = vld [vmem:[%s980_s3 + $0x128] sm:$0xff]  ;;  %v407_v31 = vld [vmem:[%s980_s3 + $0x120] sm:$0xff]  ;;  %v382_v35 = vld [vmem:[%s980_s3 + $0x58] sm:$0xff]  ;;  %542 = vmatpush.msrb.mxu2 %v529_v33 }
  0x1a   :  { %482 = vmatpush.msrb.mxu1 %v417_v45  ;;  %424 = vmatpush.msra.mxu3 %v385_v25  ;;  %v406_v36 = vld [vmem:[%s980_s3 + $0x118] sm:$0xff]  ;;  %v381_v37 = vld [vmem:[%s980_s3 + $0x50] sm:$0xff]  ;;  %v380_v40 = vld [vmem:[%s980_s3 + $0x48] sm:$0xff] }
  0x1b   :  { %454 = vmatpush.msrb.mxu0 %v400_v50  ;;  %v405_v38 = vld [vmem:[%s980_s3 + $0x110] sm:$0xff]  ;;  %v404_v41 = vld [vmem:[%s980_s3 + $0x108] sm:$0xff]  ;;  %v379_v42 = vld [vmem:[%s980_s3 + $0x40] sm:$0xff] }
  0x1c   :  { %483 = vmatpush.msrb.mxu1 %v416_v51  ;;  %425 = vmatpush.msra.mxu3 %v384_v28  ;;  %v528_v39 = vld [vmem:[%s982_s5 + $0x30] sm:$0xff]  ;;  %v403_v43 = vld [vmem:[%s980_s3 + $0x100] sm:$0xff]  ;;  %v527_v44 = vld [vmem:[%s982_s5 + $0x28] sm:$0xff] }
  0x1d   :  { %585 = vmatmul.msk.f32.gmra.mxu2 %vm180_vm3, %v160_v52  ;;  %455 = vmatpush.msrb.mxu0 %v399_v53  ;;  %v378_v45 = vld [vmem:[%s980_s3 + $0x38] sm:$0xff]  ;;  %v377_v47 = vld [vmem:[%s980_s3 + $0x30] sm:$0xff]  ;;  %v526_v48 = vld [vmem:[%s982_s5 + $0x20] sm:$0xff] }
  0x1e   :  { %577 = vmatmul.msk.f32.gmra.mxu0 %vm180_vm3, %v684_v18  ;;  %484 = vmatpush.msrb.mxu1 %v415_v58  ;;  %v376_v49 = vld [vmem:[%s980_s3 + $0x28] sm:$0xff]  ;;  %v375_v50 = vld [vmem:[%s980_s3 + $0x20] sm:$0xff]  ;;  %v525_v53 = vld [vmem:[%s982_s5 + $0x18] sm:$0xff] }
  0x1f   :  { %581 = vmatmul.msk.f32.gmra.mxu1 %vm180_vm3, %v116_v54  ;;  %456 = vmatpush.msrb.mxu0 %v398_v57  ;;  %v374_v54 = vld [vmem:[%s980_s3 + $0x18] sm:$0xff]  ;;  %v373_v55 = vld [vmem:[%s980_s3 + $0x10] sm:$0xff]  ;;  %v372_v58 = vld [vmem:[%s980_s3 + $0x8] sm:$0xff] }
  0x20   :  { %485 = vmatpush.msrb.mxu1 %v414_v61  ;;  %426 = vmatpush.msra.mxu3 %v383_v30  ;;  %v524_v56 = vld [vmem:[%s982_s5 + $0x10] sm:$0xff]  ;;  %v599_v59 = vld [vmem:[%s979_s2] ss:$0 sm:$0xff]  ;;  %v523_v62 = vld [vmem:[%s982_s5 + $0x8] sm:$0xff] }
  0x21   :  { %457 = vmatpush.msrb.mxu0 %v397_v60  ;;  %543 = vmatpush.msrb.mxu2 %v528_v39  ;;  %v371_v61 = vld [vmem:[%s980_s3] sm:$0xff] }
  0x22   :  { %486 = vmatpush.msrb.mxu1 %v413_v13  ;;  %427 = vmatpush.msra.mxu3 %v382_v35  ;;  %v601_v8 = vld [vmem:[%s983_s6] ss:$0 sm:$0xff] }
  0x23   :  { %458 = vmatpush.msrb.mxu0 %v396_v1  ;;  %544 = vmatpush.msrb.mxu2 %v527_v44 }
  0x24   :  { %487 = vmatpush.msrb.mxu1 %v412_v15  ;;  %428 = vmatpush.msra.mxu3 %v381_v37 }
  0x25   :  { %586 = vmatmul.msk.f32.gmra.mxu2 %vm180_vm3, %v144_v2  ;;  %459 = vmatpush.msrb.mxu0 %v395_v3 }
  0x26   :  { %578 = vmatmul.msk.f32.gmra.mxu0 %vm180_vm3, %v707_v34  ;;  %488 = vmatpush.msrb.mxu1 %v411_v19 }
  0x27   :  { %582 = vmatmul.msk.f32.gmra.mxu1 %vm180_vm3, %v135_v4  ;;  %460 = vmatpush.msrb.mxu0 %v394_v6  ;;  %v522_v4 = vld [vmem:[%s982_s5] sm:$0xff] }
  0x28   :  { %489 = vmatpush.msrb.mxu1 %v410_v22  ;;  %429 = vmatpush.msra.mxu3 %v380_v40 }
  0x29   :  { %461 = vmatpush.msrb.mxu0 %v393_v7  ;;  %545 = vmatpush.msrb.mxu2 %v526_v48 }
  0x2a   :  { %490 = vmatpush.msrb.mxu1 %v409_v26  ;;  %430 = vmatpush.msra.mxu3 %v379_v42 }
  0x2b   :  { %462 = vmatpush.msrb.mxu0 %v392_v10  ;;  %546 = vmatpush.msrb.mxu2 %v525_v53 }
  0x2c   :  { %491 = vmatpush.msrb.mxu1 %v408_v29  ;;  %431 = vmatpush.msra.mxu3 %v378_v45 }
  0x2d   :  { %587 = vmatmul.msk.f32.gmra.mxu2 %vm180_vm3, %v162_v11  ;;  %463 = vmatpush.msrb.mxu0 %v391_v14 }
  0x2e   :  { %579 = vmatmul.msk.f32.gmra.mxu0 %vm180_vm3, %v691_v23  ;;  %492 = vmatpush.msrb.mxu1 %v407_v31 }
  0x2f   :  { %583 = vmatmul.msk.f32.gmra.mxu1 %vm180_vm3, %v119_v12  ;;  %464 = vmatpush.msrb.mxu0 %v390_v17 }
  0x30   :  { %493 = vmatpush.msrb.mxu1 %v406_v36  ;;  %432 = vmatpush.msra.mxu3 %v377_v47  ;;  %v600_v47 = vld [vmem:[%s981_s4] ss:$0 sm:$0xff] }
  0x31   :  { %465 = vmatpush.msrb.mxu0 %v389_v20  ;;  %547 = vmatpush.msrb.mxu2 %v524_v56 }
  0x32   :  { %494 = vmatpush.msrb.mxu1 %v405_v38  ;;  %433 = vmatpush.msra.mxu3 %v376_v49 }
  0x33   :  { %466 = vmatpush.msrb.mxu0 %v388_v24  ;;  %548 = vmatpush.msrb.mxu2 %v523_v62 }
  0x34   :  { %495 = vmatpush.msrb.mxu1 %v404_v41  ;;  %434 = vmatpush.msra.mxu3 %v375_v50 }
  0x35   :  { %467 = vmatpush.msrb.mxu0 %v387_v27  ;;  %549 = vmatpush.msrb.mxu2 %v522_v4 }
  0x36   :  { %496 = vmatpush.msrb.mxu1 %v403_v43  ;;  %435 = vmatpush.msra.mxu3 %v374_v54 }
  0x37   :  { %592 = vmatmul.msk.f32.vlgmr.msrb.gmra.mxu2 %vm180_vm3, %v679_v16 }
  0x38   :  { %436 = vmatpush.msra.mxu3 %v373_v55 }
  0x3a   :  { %437 = vmatpush.msra.mxu3 %v372_v58 }
  0x3c   :  { %438 = vmatpush.msra.mxu3 %v371_v61 }
  0x3f   :  { %593 = vmatmul.msk.f32.gmra.mxu2 %vm180_vm3, %v684_v18 }
  0x47   :  { %594 = vmatmul.msk.f32.gmra.mxu2 %vm180_vm3, %v707_v34 }
  0x4f   :  { %595 = vmatmul.msk.f32.gmra.mxu2 %vm180_vm3, %v691_v23 }
  0x93   :  { %v206_v51 = vpop.f32.mrf.mxu0 }
  0x94   :  { %v247_v52 = vpop.f32.mrf.mxu1 }
  0x95   :  { %v248_v57 = vadd.f32 %v247_v52, %v206_v51 }
  0x98   :  { %v297_v60 = vpop.f32.mrf.mxu2 }
  0x99   :  { %v309_v0 = vadd.f32 %v297_v60, %v248_v57 }
  0x9b   :  { %v317_v1 = vadd.f32 %v599_v59, %v309_v0  ;;  %v209_v2 = vpop.f32.mrf.mxu0 }
  0x9c   :  { %v250_v3 = vpop.f32.mrf.mxu1 }
  0x9d   :  { %v251_v5 = vadd.f32 %v250_v3, %v209_v2  ;;  %vm321_vm7 = vcmp.gt.f32.partialorder %v317_v1, 0.0  ;;  %v325_v6 = vmul.f32 0.01, %v317_v1 }
  0x9f   :  { %v329_v7 = vsel %vm321_vm7, %v317_v1, %v325_v6 }
  0xa0   :  { %v300_v9 = vpop.f32.mrf.mxu2  ;;  %468 = vmatmul.f32.vlgmr.msrb.gmra.mxu0 %v329_v7  ;;  %v354_v19 = vrot.slane %v329_v7, 1  ;;  %v339_v38 = vrot.slane %v329_v7, 7 }
  0xa1   :  { %v310_v10 = vadd.f32 %v300_v9, %v251_v5 }
  0xa3   :  { %v318_v11 = vadd.f32 %v599_v59, %v310_v10  ;;  %v212_v12 = vpop.f32.mrf.mxu0 }
  0xa4   :  { %v253_v13 = vpop.f32.mrf.mxu1 }
  0xa5   :  { %v254_v14 = vadd.f32 %v253_v13, %v212_v12  ;;  %vm322_vm8 = vcmp.gt.f32.partialorder %v318_v11, 0.0  ;;  %v326_v15 = vmul.f32 0.01, %v318_v11 }
  0xa7   :  { %v330_v17 = vsel %vm322_vm8, %v318_v11, %v326_v15 }
  0xa8   :  { %v303_v20 = vpop.f32.mrf.mxu2  ;;  %v355_v21 = vrot.slane %v330_v17, 1  ;;  %471 = vmatmul.f32.gmra.mxu0 %v330_v17  ;;  %v340_v46 = vrot.slane %v330_v17, 7 }
  0xa9   :  { %v311_v22 = vadd.f32 %v303_v20, %v254_v14 }
  0xaa   :  { %v356_v16 = vsel %vm137_vm1, %v354_v19, %v355_v21  ;;  %v341_v42 = vsel %vm113_vm0, %v339_v38, %v340_v46 }
  0xab   :  { %v319_v24 = vadd.f32 %v599_v59, %v311_v22  ;;  %497 = vmatmul.f32.vlgmr.msrb.gmra.mxu1 %v356_v16  ;;  %v215_v25 = vpop.f32.mrf.mxu0 }
  0xac   :  { %v256_v26 = vpop.f32.mrf.mxu1 }
  0xad   :  { %v257_v27 = vadd.f32 %v256_v26, %v215_v25  ;;  %vm323_vm9 = vcmp.gt.f32.partialorder %v319_v24, 0.0  ;;  %v327_v28 = vmul.f32 0.01, %v319_v24 }
  0xaf   :  { %v331_v29 = vsel %vm323_vm9, %v319_v24, %v327_v28 }
  0xb0   :  { %v306_v18 = vpop.f32.mrf.mxu2  ;;  %v357_v30 = vrot.slane %v331_v29, 1  ;;  %474 = vmatmul.f32.gmra.mxu0 %v331_v29  ;;  %v342_v23 = vrot.slane %v331_v29, 7 }
  0xb1   :  { %v312_v31 = vadd.f32 %v306_v18, %v257_v27 }
  0xb2   :  { %v358_v33 = vsel %vm137_vm1, %v355_v21, %v357_v30  ;;  %v343_v44 = vsel %vm113_vm0, %v340_v46, %v342_v23 }
  0xb3   :  { %v320_v35 = vadd.f32 %v599_v59, %v312_v31  ;;  %590 = vmatmul.msk.f32.gmra.mxu1 %vm731_vm4, %v358_v33 }
  0xb5   :  { %vm324_vm10 = vcmp.gt.f32.partialorder %v320_v35, 0.0  ;;  %v328_v36 = vmul.f32 0.01, %v320_v35 }
  0xb7   :  { %v332_v37 = vsel %vm324_vm10, %v320_v35, %v328_v36 }
  0xb8   :  { %v334_v39 = vrot.slane %v332_v37, 7  ;;  %v359_v34 = vrot.slane %v332_v37, 1  ;;  %477 = vmatmul.f32.gmra.mxu0 %v332_v37 }
  0xba   :  { %v349_v40 = vsel %vm113_vm0, %v334_v39, %v339_v38  ;;  %v360_v41 = vsel %vm137_vm1, %v357_v30, %v359_v34  ;;  %v366_v43 = vsel %vm137_vm1, %v359_v34, %v354_v19  ;;  %v344_v45 = vsel %vm113_vm0, %v342_v23, %v334_v39  ;;  %v551_v48 = vpop.f32.mrf.mxu2 }
  0xbb   :  { %588 = vmatmul.msk.f32.vlgmr.msra.gmra.mxu3 %vm697_vm2, %v349_v40  ;;  %503 = vmatmul.f32.gmra.mxu1 %v360_v41  ;;  %v552_v54 = vadd.f32 %v601_v8, %v551_v48 }
  0xc2   :  { %v554_v56 = vpop.f32.mrf.mxu2 }
  0xc3   :  { %442 = vmatmul.f32.gmra.mxu3 %v341_v42  ;;  %591 = vmatmul.msk.f32.gmra.mxu1 %vm793_vm6, %v366_v43  ;;  %v555_v1 = vadd.f32 %v601_v8, %v554_v56 }
  0xca   :  { %v557_v7 = vpop.f32.mrf.mxu2 }
  0xcb   :  { %589 = vmatmul.msk.f32.gmra.mxu3 %vm769_vm5, %v343_v44  ;;  %v558_v13 = vadd.f32 %v601_v8, %v557_v7 }
  0xd2   :  { %v560_v16 = vpop.f32.mrf.mxu2 }
  0xd3   :  { %448 = vmatmul.f32.gmra.mxu3 %v344_v45  ;;  %v561_v26 = vadd.f32 %v601_v8, %v560_v16 }
 0x11d   :  { %v469_v32 = vpop.f32.mrf.mxu0 }
 0x125   :  { %v472_v63 = vpop.f32.mrf.mxu0 }
 0x128   :  { %v498_v49 = vpop.f32.mrf.mxu1 }
 0x12d   :  { %v475_v3 = vpop.f32.mrf.mxu0 }
 0x130   :  { %v501_v57 = vpop.f32.mrf.mxu1 }
 0x135   :  { %v478_v20 = vpop.f32.mrf.mxu0 }
 0x138   :  { %v504_v9 = vpop.f32.mrf.mxu1 }
 0x13e   :  { %v440_v50 = vpop.f32.mrf.mxu3 }
 0x13f   :  { %v441_v51 = vadd.f32 %v600_v47, %v440_v50 }
 0x140   :  { %v507_v24 = vpop.f32.mrf.mxu1 }
 0x141   :  { %v470_v52 = vadd.f32 %v469_v32, %v441_v51 }
 0x143   :  { %v499_v53 = vadd.f32 %v498_v49, %v470_v52 }
 0x145   :  { %vm510_vm11 = vcmp.gt.f32.partialorder %v499_v53, 0.0  ;;  %v514_v55 = vmul.f32 0.01, %v499_v53 }
 0x146   :  { %v443_v58 = vpop.f32.mrf.mxu3 }
 0x147   :  { %v518_v59 = vsel %vm510_vm11, %v499_v53, %v514_v55  ;;  %v444_v60 = vadd.f32 %v600_v47, %v443_v58 }
 0x148   :  { %v563_v61 = vadd.f32 %v552_v54, %v518_v59 }
 0x149   :  { %v473_v62 = vadd.f32 %v472_v63, %v444_v60 }
 0x14a   :  { %567 = vst [vmem:[%s984_s7] sm:$0xff] %v563_v61 }
 0x14b   :  { %v502_v0 = vadd.f32 %v501_v57, %v473_v62 }
 0x14d   :  { %vm511_vm12 = vcmp.gt.f32.partialorder %v502_v0, 0.0  ;;  %v515_v2 = vmul.f32 0.01, %v502_v0 }
 0x14e   :  { %v446_v4 = vpop.f32.mrf.mxu3 }
 0x14f   :  { %v519_v5 = vsel %vm511_vm12, %v502_v0, %v515_v2  ;;  %v447_v6 = vadd.f32 %v600_v47, %v446_v4 }
 0x150   :  { %v564_v10 = vadd.f32 %v555_v1, %v519_v5 }
 0x151   :  { %v476_v11 = vadd.f32 %v475_v3, %v447_v6 }
 0x152   :  { %568 = vst [vmem:[%s984_s7 + $0x8] sm:$0xff] %v564_v10 }
 0x153   :  { %v505_v12 = vadd.f32 %v504_v9, %v476_v11 }
 0x155   :  { %vm512_vm13 = vcmp.gt.f32.partialorder %v505_v12, 0.0  ;;  %v516_v14 = vmul.f32 0.01, %v505_v12 }
 0x156   :  { %v449_v15 = vpop.f32.mrf.mxu3 }
 0x157   :  { %v520_v17 = vsel %vm512_vm13, %v505_v12, %v516_v14  ;;  %v450_v19 = vadd.f32 %v600_v47, %v449_v15 }
 0x158   :  { %v565_v21 = vadd.f32 %v558_v13, %v520_v17 }
 0x159   :  { %v479_v22 = vadd.f32 %v478_v20, %v450_v19 }
 0x15a   :  { %569 = vst [vmem:[%s984_s7 + $0x10] sm:$0xff] %v565_v21 }
 0x15b   :  { %v508_v25 = vadd.f32 %v507_v24, %v479_v22 }
 0x15d   :  { %vm513_vm14 = vcmp.gt.f32.partialorder %v508_v25, 0.0  ;;  %v517_v27 = vmul.f32 0.01, %v508_v25 }
 0x15f   :  { %v521_v28 = vsel %vm513_vm14, %v508_v25, %v517_v27 }
 0x160   :  { %v566_v29 = vadd.f32 %v561_v26, %v521_v28 }
 0x162   :  { %570 = vst [vmem:[%s984_s7 + $0x18] sm:$0xff] %v566_v29 }
 0x163   :  { %575 = vsyncpa [#allocation3], 1 }

</bundles_post_ra>
